<compile_context>
chip_gen: v6e
topology: v6e:2x2x1
jax: 0.10.0
libtpu: 0.0.40
codegen_flags: <defaults>
</compile_context>

<pallas_src>
import math
import jax
import jax.numpy as jnp
from jax.experimental import pallas as pl
from jax.experimental.pallas import tpu as pltpu


# ----------------------------------------------------------------------------
# helpers
# ----------------------------------------------------------------------------
def _rup(x, m):
    return ((x + m - 1) // m) * m


def _choose_tiling(N, L, lane_cap=2048):
    """Pick (NB, Lp): batch elems per grid step and padded per-segment length.

    Hard requirement: lanes = NB*Lp is a multiple of 128 (lane-dense output,
    unmasked vst).  Preferences, in order: >=2 grid steps when N >= 2 (both
    v7x TensorCores busy, DMA/compute overlap), no time padding, lanes within
    the cap, lanes as large as possible under the cap.
    """
    best_key, best = None, (1, _rup(L, 128))
    for Lp in sorted({L, _rup(L, 128)}):
        for nb in range(1, N + 1):
            if N % nb:
                continue
            lanes = nb * Lp
            if lanes % 128:
                continue
            steps = N // nb
            key = (steps >= min(2, N),
                   Lp == L,
                   lanes <= lane_cap,
                   lanes if lanes <= lane_cap else -lanes)
            if best_key is None or key > best_key:
                best_key, best = key, (nb, Lp)
    return best


def _vmem_limit_bytes():
    """~100 MiB on v5e/v6e (128 MiB VMEM), ~48 MiB on v7x (64 MiB VMEM)."""
    try:
        cap = pltpu.get_tpu_info().vmem_capacity_bytes
    except Exception:
        cap = 128 * 1024 * 1024
    return int(min(cap * 3 // 4, 100 * 1024 * 1024))


def _pad_w(w, coutp, cinp):
    cout, cin, _ = w.shape
    return jnp.pad(w, ((0, coutp - cout), (0, cinp - cin), (0, 0)))


def _idx_lane(g):
    return (0, g)


def _idx_const2(g):
    return (0, 0)


def _idx_const3(g):
    return (0, 0, 0)


def _full_spec(arr):
    return pl.BlockSpec(arr.shape, _idx_const2 if arr.ndim == 2 else _idx_const3)


# ----------------------------------------------------------------------------
# fused TCN kernel
# ----------------------------------------------------------------------------
def make_tcn_kernel(cfgs, Lp, lanes, use_bf16):
    """All TemporalBlocks fused into one kernel invocation.

    In-kernel layout: (channels, batch*time); channels on sublanes (multiple
    of 8), batch*time packed on lanes (multiple of 128, multiple of Lp).
    """
    uniq_shifts = sorted({s for cfg in cfgs for s in cfg["shifts"] if s > 0})

    def kernel(*refs):
        it = iter(refs)
        x_ref = next(it)
        bias_ref = next(it)
        layer_refs = []
        for cfg in cfgs:
            n = 2 + (1 if (cfg["has_down"] and not cfg["fuse_down"]) else 0)
            layer_refs.append(tuple(next(it) for _ in range(n)))
        out_ref = next(it)

        # Per-segment time index.  Each grid block starts at a multiple of Lp
        # and lanes is an exact multiple of Lp, so a block-local iota is exact.
        t_mod = jax.lax.broadcasted_iota(jnp.int32, (1, lanes), 1) % Lp
        # Hoisted causal masks: one compare per unique shift per grid step,
        # reused across conv1/conv2 and across layers (review: no per-tap CSE).
        masks = {s: t_mod >= s for s in uniq_shifts}

        def cast(v):
            # Activations stay f32 for all VPU work; cast only at the dot.
            return v.astype(jnp.bfloat16) if use_bf16 else v

        def mxu(w, v):
            return jnp.dot(w, cast(v), preferred_element_type=jnp.float32)

        def tap(v, s):
            if s == 0:
                return v
            # Circular lane roll (XLU); wrapped / cross-segment lanes are the
            # positions with t_mod < s, which the mask zeroes (causal pad).
            return jnp.where(masks[s], pltpu.roll(v, shift=s, axis=1), 0.0)

        def conv_concat(v, w_ref, shifts):
            # im2col: one (rows, na*C) x (na*C, lanes) dot.
            parts = [tap(v, s) for s in shifts]
            slab = parts[0] if len(parts) == 1 else jnp.concatenate(parts, axis=0)
            return mxu(w_ref[...], slab)

        def conv_taps(v, w_ref, shifts):
            # Wide layers: per-tap accumulated dots, no k-sized live slab.
            acc = None
            for j, s in enumerate(shifts):
                term = mxu(w_ref[j], tap(v, s))
                acc = term if acc is None else acc + term
            return acc

        def bias(off, rows):
            return bias_ref[pl.ds(off, rows), :]     # static, 8-aligned slice

        a = x_ref[...]                               # (Cin0_pad, lanes), f32
        for cfg, lrefs in zip(cfgs, layer_refs):
            coutp = cfg["coutp"]
            shifts = cfg["shifts"]
            w1_ref, w2_ref = lrefs[0], lrefs[1]
            conv1 = conv_concat if cfg["conv1_path"] == "concat" else conv_taps
            conv2 = conv_concat if cfg["conv2_path"] == "concat" else conv_taps

            # conv1 -> chomp -> ReLU -> dropout (eval = identity); the fused
            # variant also produces the 1x1 downsample residual in rows
            # [coutp:2*coutp] of the same dot.
            pre = conv1(a, w1_ref, shifts)
            if cfg["fuse_down"]:
                h = jnp.maximum(pre[:coutp] + bias(cfg["b1_off"], coutp), 0.0)
                res = pre[coutp:] + bias(cfg["bd_off"], coutp)
            else:
                h = jnp.maximum(pre + bias(cfg["b1_off"], coutp), 0.0)
                if cfg["has_down"]:
                    res = mxu(lrefs[2][...], a) + bias(cfg["bd_off"], coutp)
                else:
                    res = a
            # conv2 -> chomp -> ReLU -> dropout (eval = identity)
            o = jnp.maximum(conv2(h, w2_ref, shifts) + bias(cfg["b2_off"], coutp), 0.0)
            a = jnp.maximum(o + res, 0.0)

        out_ref[...] = a

    return kernel


# ----------------------------------------------------------------------------
# wrapper
# ----------------------------------------------------------------------------
def tcn_forward(x, layer_params, kernel_size, use_bf16=False):
    """TemporalConvNet forward.  x: (N, C_in, L) float32 -> (N, C_out, L)."""
    del kernel_size  # per-layer k is read from the weights themselves
    N, C_in, L = x.shape
    NB, Lp = _choose_tiling(N, L)
    lanes = NB * Lp
    num_steps = N // NB

    # ---- layout glue (XLA side): channels -> sublanes, batch*time -> lanes --
    C0p = _rup(C_in, 8)
    xp = jnp.pad(x, ((0, 0), (0, 0), (0, Lp - L)))          # inert: causal conv
    x2d = jnp.transpose(xp, (1, 0, 2)).reshape(C_in, N * Lp)
    x2d = jnp.pad(x2d, ((0, C0p - C_in), (0, 0)))

    w_dtype = jnp.bfloat16 if use_bf16 else jnp.float32

    bias_rows = []

    def add_bias(vec, coutp, cout):
        off = sum(r.shape[0] for r in bias_rows)
        bias_rows.append(jnp.pad(vec, (0, coutp - cout)).reshape(coutp, 1))
        return off

    cfgs = []
    weight_inputs, weight_specs = [], []
    cin, cinp = C_in, C0p
    for i, p in enumerate(layer_params):
        cout, _, k = p["w1"].shape
        d = 2 ** i
        coutp = _rup(cout, 8)
        # TODO(synk): pad channels toward the MXU granule (128/256) when
        #             channels are already large; with tiny channels the
        #             kernel is VPU/DMA-bound, not MXU-bound.
        shifts_all = [(k - 1 - j) * d for j in range(k)]     # tap j <-> shift
        # Taps with shift >= L only ever write padded/time-padded positions,
        # which never feed back into real outputs (causal) -> drop them.
        active = [(j, s) for j, s in enumerate(shifts_all) if s < L]
        shifts = [s for _, s in active]
        has_down = cin != cout
        conv1_path = "concat" if cinp < 128 else "tap"
        conv2_path = "concat" if coutp < 128 else "tap"
        fuse_down = has_down and conv1_path == "concat"

        w1p = _pad_w(p["w1"], coutp, cinp)                   # (coutp, cinp, k)
        w2p = _pad_w(p["w2"], coutp, coutp)

        def concat_w(wpad, taps):
            return jnp.concatenate([wpad[:, :, j] for j, _ in taps], axis=1)

        def tap_w(wpad, taps):
            return jnp.stack([wpad[:, :, j] for j, _ in taps], axis=0)

        if conv1_path == "concat":
            w1m = concat_w(w1p, active)                      # (coutp, na*cinp)
            if fuse_down:
                wd_pad = jnp.pad(p["wd"], ((0, coutp - cout), (0, cinp - cin)))
                bottom = jnp.zeros((coutp, len(active) * cinp), jnp.float32)
                bottom = bottom.at[:, (len(active) - 1) * cinp:].set(wd_pad)
                w1m = jnp.concatenate([w1m, bottom], axis=0)  # (2*coutp, na*cinp)
        else:
            w1m = tap_w(w1p, active)                          # (na, coutp, cinp)
        w2m = concat_w(w2p, active) if conv2_path == "concat" else tap_w(w2p, active)

        w1m = w1m.astype(w_dtype)
        w2m = w2m.astype(w_dtype)
        weight_inputs += [w1m, w2m]
        weight_specs += [_full_spec(w1m), _full_spec(w2m)]
        if has_down and not fuse_down:
            wd_pad = jnp.pad(p["wd"], ((0, coutp - cout), (0, cinp - cin))).astype(w_dtype)
            weight_inputs.append(wd_pad)
            weight_specs.append(_full_spec(wd_pad))

        b1_off = add_bias(p["b1"], coutp, cout)
        b2_off = add_bias(p["b2"], coutp, cout)
        bd_off = add_bias(p["bd"], coutp, cout) if has_down else None

        cfgs.append(dict(coutp=coutp, cinp=cinp, shifts=shifts, has_down=has_down,
                         fuse_down=fuse_down, conv1_path=conv1_path,
                         conv2_path=conv2_path, b1_off=b1_off, b2_off=b2_off,
                         bd_off=bd_off))
        cin, cinp = cout, coutp

    C_last, C_lastp = cin, cinp
    bias_all = jnp.concatenate(bias_rows, axis=0)             # (rows, 1) f32

    inputs = [x2d, bias_all] + weight_inputs
    in_specs = ([pl.BlockSpec((C0p, lanes), _idx_lane), _full_spec(bias_all)]
                + weight_specs)

    kernel = make_tcn_kernel(cfgs, Lp, lanes, use_bf16)
    out2d = pl.pallas_call(
        kernel,
        out_shape=jax.ShapeDtypeStruct((C_lastp, N * Lp), jnp.float32),
        grid_spec=pltpu.PrefetchScalarGridSpec(
            num_scalar_prefetch=0,
            grid=(num_steps,),
            in_specs=in_specs,
            out_specs=pl.BlockSpec((C_lastp, lanes), _idx_lane),
        ),
        compiler_params=pltpu.CompilerParams(
            dimension_semantics=("parallel",),
            vmem_limit_bytes=_vmem_limit_bytes()),
    )(*inputs)

    out = out2d[:C_last].reshape(C_last, N, Lp)[:, :, :L]
    return jnp.transpose(out, (1, 0, 2))


# ----------------------------------------------------------------------------
# Pure-JAX reference (for correctness check)
# ----------------------------------------------------------------------------
def _conv1d_ref(x, w, b, d, p):
    y = jax.lax.conv_general_dilated(
        x, w, window_strides=(1,), padding=[(p, p)], rhs_dilation=(d,),
        dimension_numbers=("NCH", "OIH", "NCH"))
    return y + b[None, :, None]


def _block_ref(x, params, k, d):
    L = x.shape[2]
    p = (k - 1) * d
    h = _conv1d_ref(x, params["w1"], params["b1"], d, p)[:, :, :L]   # chomp
    h = jnp.maximum(h, 0.0)                                          # dropout = identity
    o = _conv1d_ref(h, params["w2"], params["b2"], d, p)[:, :, :L]   # chomp
    o = jnp.maximum(o, 0.0)
    if "wd" in params:
        res = jnp.einsum("oc,ncl->nol", params["wd"], x) + params["bd"][None, :, None]
    else:
        res = x
    return jnp.maximum(o + res, 0.0)


def tcn_reference(x, layer_params, kernel_size):
    out = x
    for i, params in enumerate(layer_params):
        out = _block_ref(out, params, kernel_size, 2 ** i)
    return out


# ----------------------------------------------------------------------------
# Deterministic parameter init (weights ~ N(0, 0.01) like the PyTorch module;
# biases ~ U(-1/sqrt(fan_in), 1/sqrt(fan_in)) like PyTorch's Conv1d default)
# ----------------------------------------------------------------------------
def init_tcn_params(key, num_inputs, num_channels, kernel_size):
    layer_params = []
    for i, c_out in enumerate(num_channels):
        c_in = num_inputs if i == 0 else num_channels[i - 1]
        key, k1, k2, k3, k4, k5, k6 = jax.random.split(key, 7)
        bnd1 = 1.0 / math.sqrt(c_in * kernel_size)
        bnd2 = 1.0 / math.sqrt(c_out * kernel_size)
        params = {
            "w1": 0.01 * jax.random.normal(k1, (c_out, c_in, kernel_size), jnp.float32),
            "b1": jax.random.uniform(k2, (c_out,), jnp.float32, -bnd1, bnd1),
            "w2": 0.01 * jax.random.normal(k3, (c_out, c_out, kernel_size), jnp.float32),
            "b2": jax.random.uniform(k4, (c_out,), jnp.float32, -bnd2, bnd2),
        }
        if c_in != c_out:
            bnd_d = 1.0 / math.sqrt(c_in)
            params["wd"] = 0.01 * jax.random.normal(k5, (c_out, c_in), jnp.float32)
            params["bd"] = jax.random.uniform(k6, (c_out,), jnp.float32, -bnd_d, bnd_d)
        layer_params.append(params)
    return layer_params


# ----------------------------------------------------------------------------
if __name__ == "__main__":
    key = jax.random.PRNGKey(0)
    N, C_IN, L = 2, 4, 16
    NUM_CHANNELS = [8, 16]
    KERNEL_SIZE = 2

    key, kp, kx = jax.random.split(key, 3)
    layer_params = init_tcn_params(kp, C_IN, NUM_CHANNELS, KERNEL_SIZE)
    x = jax.random.normal(kx, (N, C_IN, L), jnp.float32)

    y = tcn_forward(x, layer_params, KERNEL_SIZE)
    y = jax.block_until_ready(y)

    y_ref = tcn_reference(x, layer_params, KERNEL_SIZE)
    assert y.shape == (N, NUM_CHANNELS[-1], L)
    assert jnp.allclose(y, y_ref, atol=1e-4, rtol=1e-4), "mismatch vs reference"

    print("KERNEL_OK")
</pallas_src>

<mosaic_0001>
module attributes {stable_mosaic.version = 11 : i64} {
  func.func @kernel(%arg0: i32, %arg1: memref<8x128xf32, #tpu.memory_space<vmem>>, %arg2: memref<72x1xf32, #tpu.memory_space<vmem>>, %arg3: memref<16x16xf32, #tpu.memory_space<vmem>>, %arg4: memref<8x16xf32, #tpu.memory_space<vmem>>, %arg5: memref<32x16xf32, #tpu.memory_space<vmem>>, %arg6: memref<16x32xf32, #tpu.memory_space<vmem>>, %arg7: memref<16x128xf32, #tpu.memory_space<vmem>>) attributes {dimension_semantics = [#tpu.dimension_semantics<parallel>], iteration_bounds = array<i64: 2>, scalar_prefetch = 0 : i64, scratch_operands = 0 : i64, tpu.core_type = #tpu.core_type<tc>, window_params = [{transform_indices = @transform_0, window_bounds = array<i64: 8, 128>}, {pipeline_mode = #tpu.pipeline_mode<synchronous>, transform_indices = @transform_1, window_bounds = array<i64: 72, 1>}, {pipeline_mode = #tpu.pipeline_mode<synchronous>, transform_indices = @transform_2, window_bounds = array<i64: 16, 16>}, {pipeline_mode = #tpu.pipeline_mode<synchronous>, transform_indices = @transform_3, window_bounds = array<i64: 8, 16>}, {pipeline_mode = #tpu.pipeline_mode<synchronous>, transform_indices = @transform_4, window_bounds = array<i64: 32, 16>}, {pipeline_mode = #tpu.pipeline_mode<synchronous>, transform_indices = @transform_5, window_bounds = array<i64: 16, 32>}, {transform_indices = @transform_6, window_bounds = array<i64: 16, 128>}]} {
    %0 = tpu.iota {dimensions = array<i32: 1>} : vector<1x128xi32>
    %c128_i32 = arith.constant 128 : i32
    %c0_i32 = arith.constant 0 : i32
    %1 = arith.cmpi eq, %c128_i32, %c0_i32 : i32
    %c1_i32 = arith.constant 1 : i32
    %2 = arith.select %1, %c1_i32, %c128_i32 : i32
    %3 = vector.broadcast %2 : i32 to vector<1x128xi32>
    %4 = arith.remsi %0, %3 : vector<1x128xi32>
    %c0_i32_0 = arith.constant 0 : i32
    %5 = vector.broadcast %c0_i32_0 : i32 to vector<1x128xi32>
    %6 = arith.cmpi ne, %4, %5 : vector<1x128xi32>
    %c0_i32_1 = arith.constant 0 : i32
    %7 = vector.broadcast %c0_i32_1 : i32 to vector<1x128xi32>
    %8 = arith.cmpi slt, %4, %7 : vector<1x128xi32>
    %c0_i32_2 = arith.constant 0 : i32
    %9 = arith.cmpi slt, %2, %c0_i32_2 : i32
    %10 = vector.broadcast %9 : i1 to vector<1x128xi1>
    %11 = vector.broadcast %10 : vector<1x128xi1> to vector<1x128xi1>
    %12 = arith.xori %8, %11 : vector<1x128xi1>
    %13 = arith.andi %12, %6 : vector<1x128xi1>
    %14 = vector.broadcast %2 : i32 to vector<1x128xi32>
    %15 = arith.addi %4, %14 : vector<1x128xi32>
    %16 = arith.select %13, %15, %4 : vector<1x128xi1>, vector<1x128xi32>
    %c1_i32_3 = arith.constant 1 : i32
    %17 = vector.broadcast %c1_i32_3 : i32 to vector<1x128xi32>
    %18 = arith.cmpi sge, %16, %17 : vector<1x128xi32>
    %c2_i32 = arith.constant 2 : i32
    %19 = vector.broadcast %c2_i32 : i32 to vector<1x128xi32>
    %20 = arith.cmpi sge, %16, %19 : vector<1x128xi32>
    %c0 = arith.constant 0 : index
    %c0_4 = arith.constant 0 : index
    %21 = vector.load %arg1[%c0, %c0_4] : memref<8x128xf32, #tpu.memory_space<vmem>>, vector<8x128xf32>
    %c1_i32_5 = arith.constant 1 : i32
    %22 = tpu.dynamic_rotate %21 by %c1_i32_5 dim 1 : vector<8x128xf32>, i32 -> vector<8x128xf32>
    %cst = arith.constant 0.000000e+00 : f32
    %23 = vector.shape_cast %18 : vector<1x128xi1> to vector<1x128xi1>
    %24 = vector.broadcast %23 : vector<1x128xi1> to vector<8x128xi1>
    %25 = vector.broadcast %cst : f32 to vector<8x128xf32>
    %26 = arith.select %24, %22, %25 : vector<8x128xi1>, vector<8x128xf32>
    %27 = tpu.concatenate %26, %21 in 0 : vector<8x128xf32>, vector<8x128xf32> -> vector<16x128xf32>
    %c0_6 = arith.constant 0 : index
    %c0_7 = arith.constant 0 : index
    %28 = vector.load %arg3[%c0_6, %c0_7] : memref<16x16xf32, #tpu.memory_space<vmem>>, vector<16x16xf32>
    %cst_8 = arith.constant dense<0.000000e+00> : vector<16x128xf32>
    %29 = tpu.matmul %28, %27, %cst_8 {dimension_numbers = #tpu.dot_dimension_numbers<[1], [0], [0], [1], [0, 0, 1, 1], [], []>} : vector<16x16xf32>, vector<16x128xf32>, vector<16x128xf32> -> vector<16x128xf32>
    %30 = vector.extract_strided_slice %29 {offsets = [0, 0], sizes = [8, 128], strides = [1, 1]} : vector<16x128xf32> to vector<8x128xf32>
    %c0_9 = arith.constant 0 : index
    %c0_10 = arith.constant 0 : index
    %31 = vector.load %arg2[%c0_9, %c0_10] : memref<72x1xf32, #tpu.memory_space<vmem>>, vector<8x1xf32>
    %32 = vector.broadcast %31 : vector<8x1xf32> to vector<8x128xf32>
    %33 = arith.addf %30, %32 : vector<8x128xf32>
    %cst_11 = arith.constant 0.000000e+00 : f32
    %34 = vector.broadcast %cst_11 : f32 to vector<8x128xf32>
    %35 = arith.maximumf %33, %34 : vector<8x128xf32>
    %36 = vector.extract_strided_slice %29 {offsets = [8, 0], sizes = [8, 128], strides = [1, 1]} : vector<16x128xf32> to vector<8x128xf32>
    %c16 = arith.constant 16 : index
    %c0_12 = arith.constant 0 : index
    %37 = vector.load %arg2[%c16, %c0_12] : memref<72x1xf32, #tpu.memory_space<vmem>>, vector<8x1xf32>
    %38 = vector.broadcast %37 : vector<8x1xf32> to vector<8x128xf32>
    %39 = arith.addf %36, %38 : vector<8x128xf32>
    %c1_i32_13 = arith.constant 1 : i32
    %40 = tpu.dynamic_rotate %35 by %c1_i32_13 dim 1 : vector<8x128xf32>, i32 -> vector<8x128xf32>
    %cst_14 = arith.constant 0.000000e+00 : f32
    %41 = vector.shape_cast %18 : vector<1x128xi1> to vector<1x128xi1>
    %42 = vector.broadcast %41 : vector<1x128xi1> to vector<8x128xi1>
    %43 = vector.broadcast %cst_14 : f32 to vector<8x128xf32>
    %44 = arith.select %42, %40, %43 : vector<8x128xi1>, vector<8x128xf32>
    %45 = tpu.concatenate %44, %35 in 0 : vector<8x128xf32>, vector<8x128xf32> -> vector<16x128xf32>
    %c0_15 = arith.constant 0 : index
    %c0_16 = arith.constant 0 : index
    %46 = vector.load %arg4[%c0_15, %c0_16] : memref<8x16xf32, #tpu.memory_space<vmem>>, vector<8x16xf32>
    %cst_17 = arith.constant dense<0.000000e+00> : vector<8x128xf32>
    %47 = tpu.matmul %46, %45, %cst_17 {dimension_numbers = #tpu.dot_dimension_numbers<[1], [0], [0], [1], [0, 0, 1, 1], [], []>} : vector<8x16xf32>, vector<16x128xf32>, vector<8x128xf32> -> vector<8x128xf32>
    %c8 = arith.constant 8 : index
    %c0_18 = arith.constant 0 : index
    %48 = vector.load %arg2[%c8, %c0_18] : memref<72x1xf32, #tpu.memory_space<vmem>>, vector<8x1xf32>
    %49 = vector.broadcast %48 : vector<8x1xf32> to vector<8x128xf32>
    %50 = arith.addf %47, %49 : vector<8x128xf32>
    %cst_19 = arith.constant 0.000000e+00 : f32
    %51 = vector.broadcast %cst_19 : f32 to vector<8x128xf32>
    %52 = arith.maximumf %50, %51 : vector<8x128xf32>
    %53 = arith.addf %52, %39 : vector<8x128xf32>
    %cst_20 = arith.constant 0.000000e+00 : f32
    %54 = vector.broadcast %cst_20 : f32 to vector<8x128xf32>
    %55 = arith.maximumf %53, %54 : vector<8x128xf32>
    %c2_i32_21 = arith.constant 2 : i32
    %56 = tpu.dynamic_rotate %55 by %c2_i32_21 dim 1 : vector<8x128xf32>, i32 -> vector<8x128xf32>
    %cst_22 = arith.constant 0.000000e+00 : f32
    %57 = vector.shape_cast %20 : vector<1x128xi1> to vector<1x128xi1>
    %58 = vector.broadcast %57 : vector<1x128xi1> to vector<8x128xi1>
    %59 = vector.broadcast %cst_22 : f32 to vector<8x128xf32>
    %60 = arith.select %58, %56, %59 : vector<8x128xi1>, vector<8x128xf32>
    %61 = tpu.concatenate %60, %55 in 0 : vector<8x128xf32>, vector<8x128xf32> -> vector<16x128xf32>
    %c0_23 = arith.constant 0 : index
    %c0_24 = arith.constant 0 : index
    %62 = vector.load %arg5[%c0_23, %c0_24] : memref<32x16xf32, #tpu.memory_space<vmem>>, vector<32x16xf32>
    %cst_25 = arith.constant dense<0.000000e+00> : vector<32x128xf32>
    %63 = tpu.matmul %62, %61, %cst_25 {dimension_numbers = #tpu.dot_dimension_numbers<[1], [0], [0], [1], [0, 0, 1, 1], [], []>} : vector<32x16xf32>, vector<16x128xf32>, vector<32x128xf32> -> vector<32x128xf32>
    %64 = vector.extract_strided_slice %63 {offsets = [0, 0], sizes = [16, 128], strides = [1, 1]} : vector<32x128xf32> to vector<16x128xf32>
    %c24 = arith.constant 24 : index
    %c0_26 = arith.constant 0 : index
    %65 = vector.load %arg2[%c24, %c0_26] : memref<72x1xf32, #tpu.memory_space<vmem>>, vector<16x1xf32>
    %66 = vector.broadcast %65 : vector<16x1xf32> to vector<16x128xf32>
    %67 = arith.addf %64, %66 : vector<16x128xf32>
    %cst_27 = arith.constant 0.000000e+00 : f32
    %68 = vector.broadcast %cst_27 : f32 to vector<16x128xf32>
    %69 = arith.maximumf %67, %68 : vector<16x128xf32>
    %70 = vector.extract_strided_slice %63 {offsets = [16, 0], sizes = [16, 128], strides = [1, 1]} : vector<32x128xf32> to vector<16x128xf32>
    %c56 = arith.constant 56 : index
    %c0_28 = arith.constant 0 : index
    %71 = vector.load %arg2[%c56, %c0_28] : memref<72x1xf32, #tpu.memory_space<vmem>>, vector<16x1xf32>
    %72 = vector.broadcast %71 : vector<16x1xf32> to vector<16x128xf32>
    %73 = arith.addf %70, %72 : vector<16x128xf32>
    %c2_i32_29 = arith.constant 2 : i32
    %74 = tpu.dynamic_rotate %69 by %c2_i32_29 dim 1 : vector<16x128xf32>, i32 -> vector<16x128xf32>
    %cst_30 = arith.constant 0.000000e+00 : f32
    %75 = vector.shape_cast %20 : vector<1x128xi1> to vector<1x128xi1>
    %76 = vector.broadcast %75 : vector<1x128xi1> to vector<16x128xi1>
    %77 = vector.broadcast %cst_30 : f32 to vector<16x128xf32>
    %78 = arith.select %76, %74, %77 : vector<16x128xi1>, vector<16x128xf32>
    %79 = tpu.concatenate %78, %69 in 0 : vector<16x128xf32>, vector<16x128xf32> -> vector<32x128xf32>
    %c0_31 = arith.constant 0 : index
    %c0_32 = arith.constant 0 : index
    %80 = vector.load %arg6[%c0_31, %c0_32] : memref<16x32xf32, #tpu.memory_space<vmem>>, vector<16x32xf32>
    %cst_33 = arith.constant dense<0.000000e+00> : vector<16x128xf32>
    %81 = tpu.matmul %80, %79, %cst_33 {dimension_numbers = #tpu.dot_dimension_numbers<[1], [0], [0], [1], [0, 0, 1, 1], [], []>} : vector<16x32xf32>, vector<32x128xf32>, vector<16x128xf32> -> vector<16x128xf32>
    %c40 = arith.constant 40 : index
    %c0_34 = arith.constant 0 : index
    %82 = vector.load %arg2[%c40, %c0_34] : memref<72x1xf32, #tpu.memory_space<vmem>>, vector<16x1xf32>
    %83 = vector.broadcast %82 : vector<16x1xf32> to vector<16x128xf32>
    %84 = arith.addf %81, %83 : vector<16x128xf32>
    %cst_35 = arith.constant 0.000000e+00 : f32
    %85 = vector.broadcast %cst_35 : f32 to vector<16x128xf32>
    %86 = arith.maximumf %84, %85 : vector<16x128xf32>
    %87 = arith.addf %86, %73 : vector<16x128xf32>
    %cst_36 = arith.constant 0.000000e+00 : f32
    %88 = vector.broadcast %cst_36 : f32 to vector<16x128xf32>
    %89 = arith.maximumf %87, %88 : vector<16x128xf32>
    %c0_37 = arith.constant 0 : index
    %c0_38 = arith.constant 0 : index
    %90 = vector.load %arg7[%c0_37, %c0_38] : memref<16x128xf32, #tpu.memory_space<vmem>>, vector<16x128xf32>
    tpu.vector_store %arg7[%c0_37, %c0_38], %89 {strides = array<i32>} : memref<16x128xf32, #tpu.memory_space<vmem>>, vector<16x128xf32>,
    return
  }
  func.func @transform_0(%arg0: i32) -> (i32, i32) {
    %c0_i32 = arith.constant 0 : i32
    %c0_i32_0 = arith.constant 0 : i32
    return %c0_i32, %arg0 : i32, i32
  }
  func.func @transform_1(%arg0: i32) -> (i32, i32) {
    %c0_i32 = arith.constant 0 : i32
    %c0_i32_0 = arith.constant 0 : i32
    %c0_i32_1 = arith.constant 0 : i32
    return %c0_i32, %c0_i32_0 : i32, i32
  }
  func.func @transform_2(%arg0: i32) -> (i32, i32) {
    %c0_i32 = arith.constant 0 : i32
    %c0_i32_0 = arith.constant 0 : i32
    %c0_i32_1 = arith.constant 0 : i32
    return %c0_i32, %c0_i32_0 : i32, i32
  }
  func.func @transform_3(%arg0: i32) -> (i32, i32) {
    %c0_i32 = arith.constant 0 : i32
    %c0_i32_0 = arith.constant 0 : i32
    %c0_i32_1 = arith.constant 0 : i32
    return %c0_i32, %c0_i32_0 : i32, i32
  }
  func.func @transform_4(%arg0: i32) -> (i32, i32) {
    %c0_i32 = arith.constant 0 : i32
    %c0_i32_0 = arith.constant 0 : i32
    %c0_i32_1 = arith.constant 0 : i32
    return %c0_i32, %c0_i32_0 : i32, i32
  }
  func.func @transform_5(%arg0: i32) -> (i32, i32) {
    %c0_i32 = arith.constant 0 : i32
    %c0_i32_0 = arith.constant 0 : i32
    %c0_i32_1 = arith.constant 0 : i32
    return %c0_i32, %c0_i32_0 : i32, i32
  }
  func.func @transform_6(%arg0: i32) -> (i32, i32) {
    %c0_i32 = arith.constant 0 : i32
    %c0_i32_0 = arith.constant 0 : i32
    return %c0_i32, %arg0 : i32, i32
  }
}

</mosaic_0001>

<bundles_post_ra>
// kernel: tpu_custom_call.1
= control target key start
LH: loop header
LB: loop body
LE: loop exit
PB: predicated region body
PF: predicated region fallthrough
CT: control target
= control target key end

     0   :  { %11 = vsyncpa [#allocation3], 0  ;;  %s1198_s0 = inlined_call_operand.vmem [shape: f32[8,256], index: 0, kind: input, shape index: {}]   ;;  %s1199_s1 = inlined_call_operand.vmem [shape: f32[72,1], index: 1, kind: input, shape index: {}]   ;;  %s1200_s2 = inlined_call_operand.vmem [shape: f32[16,16], index: 2, kind: input, shape index: {}]   ;;  %s1201_s3 = inlined_call_operand.vmem [shape: f32[8,16], index: 3, kind: input, shape index: {}]   ;;  %s1202_s4 = inlined_call_operand.vmem [shape: f32[32,16], index: 4, kind: input, shape index: {}]   ;;  %s1203_s5 = inlined_call_operand.vmem [shape: f32[16,32], index: 5, kind: input, shape index: {}]   ;;  %s1204_s6 = inlined_call_operand.hbm [shape: f32[16,256], index: 6, kind: output, shape index: {}]  }
   0x1   :  { %13 = vsyncpa [#allocation3 + $0x1], 0  ;;  %s1008_s21 = smov 0   ;;  %s1010_s22 = smov 0  }
   0x2   :  { %s1012_s23 = smov 0   ;;  %s1014_s24 = smov 0  }
   0x3 LB: > { %s1029_s25 = sadd.s32 4294967295, %s962_s24   ;;  %s775_s26 = sadd.s32 4294967294, %s962_s24   ;;  %s962_s24 = sphi %s1014_s24, %s1210_s24   ;;  %s958_s23 = sphi %s1012_s23, %s1209_s23   ;;  %s954_s22 = sphi %s1010_s22, %s1208_s22   ;;  %s950_s21 = sphi %s1008_s21, %s1207_s21  }
   0x4   : > { %s1033_s27 = sadd.s32 1, %s962_s24   ;;  %s157_s28 = sadd.s32 1, %s958_s23 }
   0x5   : > { %s154_s29 = ssub.s32 %s962_s24, %s1033_s27  ;;  %p167_p0 = scmp.ne.s32.totalorder %s958_s23, %s954_s22 }
   0x6   : > { %p155_p1 = scmp.eq.s32.totalorder %s154_s29, 0  ;;  %p168_p2 = scmp.eq.s32.totalorder %s1029_s25, 1 }
   0x7   : > { %p173_p3 = scmp.ne.s32.totalorder %s954_s22, %s950_s21  ;;  %p174_p4 = scmp.eq.s32.totalorder %s775_s26, 1 }
   0x8   : > { %s1044_s30 = scalar_select %p155_p1, %s958_s23, %s157_s28  }
   0x9   : > { %p1046_p5 = por %p168_p2, %p167_p0  ;;  %p1050_p6 = por %p174_p4, %p173_p3 }
   0xa   : > { %p778_p7 = scmp.ge.s32.totalorder %s962_s24, 1  ;;  %p214_p8 = scmp.lt.s32.totalorder %s962_s24, 3 }
   0xc   : > { %p215_p9 = pnand %p778_p7, %p214_p8 }
   0xd   : > { %p243_p10 = scmp.lt.s32.totalorder (!%p215_p9), %s1029_s25, 1  ;;  %s965_s16 = smov (!%p215_p9), 1  }
   0xe   : > { %218 = sbr.rel (%p215_p9) target bundleno = 1308 (0x51c), region = 44  ;;  %s240_s28 = sand.u32 (!%p215_p9), 1, %s954_s22  }
   0xf   : > { %s779_s29 = sshll.u32 (!%p215_p9), %s240_s28, 4 }
  0x10   : > { %s242_s9 = scalar_lea.vmem (!%p215_p9), [#allocation2], %s779_s29 }
  0x11   : > { %s713_s10 = sshll.u32 (!%p215_p9), %s242_s9, 4  ;;  %s1151_s10 = int_to_ptr.vmem [resolvable:$true] %s713_s10 }
  0x12   : > { %s902_s17 = scalar_lea.vmem (!%p215_p9), %s1151_s10, 256 }
  0x13   : > { %v269_v0 = vld [vmem:[%s1200_s2] sm:$0xff]  ;;  %vm271_vm0 = vcmask 130048   ;;  %v964_v1 = vmov 0   ;;  %s244_s11 = scalar_select %p243_p10, %s1029_s25, 1  ;;  %v247_v4 = vlaneseq  ;;  %v270_v7 = vld [vmem:[%s1200_s2 + $0x8] sm:$0xff]  ;;  %v966_v8 = vmov 0.0  }
  0x14   : > { %822 = vmatprep.mubr.msk.f32.mxu0 %vm271_vm0, %v269_v0  ;;  %900 = vset.pattern.permute.xlu0 %v964_v1  ;;  %v353_v3 = vld [vmem:[%s1199_s1] sm:$0xff]  ;;  %vm967_vm2 = vmmov 0   ;;  %v372_v14 = vld [vmem:[%s1199_s1 + $0x8] sm:$0xff]  ;;  %v361_v15 = vld [vmem:[%s1199_s1 + $0x10] sm:$0xff]  ;;  %vm610_vm4 = vcmask 261120   ;;  %p903_p11 = scmp.ne.s32.totalorder %s1151_s10, %s902_s17 }
  0x15   : > { %901 = vset.pattern.permute.xlu1 %v964_v1  ;;  %s780_s12 = sshll.u32 %s244_s11, 3  ;;  %v1068_v5 = vand.u32 127, %v247_v4  ;;  %825 = vmatprep.subr.mxu1 %v966_v8  ;;  %v561_v16 = vld [vmem:[%s1199_s1 + $0x20] sm:$0xff]  ;;  %v560_v29 = vld [vmem:[%s1199_s1 + $0x18] sm:$0xff]  ;;  %v460_v31 = vld [vmem:[%s1202_s4 + $0x8] sm:$0xff]  ;;  %s796_s11 = sshll.u32 %s1029_s25, 7 }
  0x16   : > { %s246_s15 = scalar_lea.vmem %s1198_s0, %s780_s12  ;;  %829 = vmatprep.mubr.msk.f32.mxu1 %vm967_vm2, %v966_v8  ;;  %v371_v17 = vld [vmem:[%s1201_s3] sm:$0xff]  ;;  %v461_v32 = vld [vmem:[%s1202_s4 + $0x10] sm:$0xff]  ;;  %v462_v33 = vld [vmem:[%s1202_s4 + $0x18] sm:$0xff]  ;;  %s1156_s14 = scalar_lea.hbm %s1204_s6, %s796_s11 }
  0x17   : > { %v263_v2 = vld [vmem:[%s246_s15] sm:$0xff]  ;;  %vm261_vm1 = vcmp.ge.s32.totalorder %v1068_v5, 1  ;;  %vm262_vm3 = vcmp.ge.s32.totalorder %v1068_v5, 2  ;;  %v598_v43 = vld [vmem:[%s1199_s1 + $0x28] sm:$0xff]  ;;  %v599_v44 = vld [vmem:[%s1199_s1 + $0x30] sm:$0xff]  ;;  %s1158_s15 = scalar_lea.sflag [#allocation3], %s240_s28  ;;  %p904_p12 = pnand %p903_p11, %p1046_p5 }
  0x18   : > { %264 = vrot.lane.b32.xlu0 %v263_v2, %s965_s16  ;;  %818 = vmatprep.subr.mxu0 %v263_v2  ;;  %v459_v20 = vld [vmem:[%s1202_s4] sm:$0xff]  ;;  %v576_v45 = vld [vmem:[%s1199_s1 + $0x38] sm:$0xff]  ;;  %v597_v49 = vld [vmem:[%s1203_s5 + $0x8] sm:$0xff]  ;;  %s969_s25 = smov [#allocation2]  }
  0x19   : > { %819 = vmatpush3.msra.mxu0 %v263_v2  ;;  %v596_v34 = vld [vmem:[%s1203_s5] sm:$0xff]  ;;  %p905_p13 = pneg %p904_p12  ;;  %s906_s18 = sshll.u32 %s969_s25, 4  ;;  %s907_s18 = int_to_ptr.vmem [resolvable:$false] %s906_s18 }
  0x1a   : > { %v577_v46 = vld [vmem:[%s1199_s1 + $0x40] sm:$0xff]  ;;  %s908_s19 = scalar_lea.vmem %s907_s18, 512  ;;  %p909_p0 = scmp.lt.s32.totalorder %s1151_s10, %s907_s18 }
  0x1b   : > { %p910_p1 = scmp.lt.s32.totalorder %s908_s19, %s902_s17 }
  0x1c   : > { %356 = vperm.xlu0 %900, %v353_v3  }
  0x1d   : > { %p911_p2 = por %p910_p1, %p909_p0 }
  0x1f   : > { %p912_p3 = pnand %p911_p2, %p905_p13 }
  0x8a   : > { %v265_v6 = vpop.permute.xlu0 %264 }
  0x8b   : > { %820 = vmatprep.subr.msk.mxu0 %vm261_vm1, %v265_v6 }
  0x8c   : > { %821 = vmatpush3.msk.msra.mxu0 %vm261_vm1, %v265_v6 }
  0x8d   : > { %823 = vmatmul.mubr.msk.f32.vlgmr.msra.gmra.mxu0 %vm271_vm0, %v270_v7 }
  0x8e   : > { %836 = vmatprep.mubr.msk.f32.mxu0 %vm271_vm0, %v459_v20 }
  0x97   : > { %v357_v10 = vpop.permute.xlu0 %356 }
 0x14d   : > { %v824_v9 = vpop.f32.mrf.mxu0 }
 0x14f   : > { %v344_v11 = vpop.f32.mrf.mxu0 }
 0x150   : > { %v359_v12 = vadd.f32 %v357_v10, %v344_v11 }
 0x152   : > { %v360_v13 = vmax.f32 %v359_v12, 0.0 }
 0x154   : > { %368 = vrot.lane.b32.xlu1 %v360_v13, %s965_s16  ;;  %826 = vmatpush3.msra.mxu1 %v360_v13  ;;  %s968_s16 = smov 2  }
 0x155   : > { %827 = vmatprep.subr.mxu1 %v966_v8 }
 0x158   : > { %375 = vperm.xlu1 %901, %v372_v14  }
 0x15c   : > { %364 = vperm.xlu1 %901, %v361_v15  }
 0x160   : > { %569 = vperm.xlu1 %901, %v561_v16  }
 0x1c6   : > { %v369_v18 = vpop.permute.xlu1 %368 }
 0x1c7   : > { %828 = vmatpush3.msk.msra.mxu1 %vm261_vm1, %v369_v18 }
 0x1c8   : > { %830 = vmatmul.mubr.msk.f32.vlgmr.msra.gmra.mxu1 %vm271_vm0, %v371_v17 }
 0x1c9   : > { %850 = vmatprep.mubr.msk.f32.mxu1 %vm610_vm4, %v596_v34 }
 0x1d3   : > { %v376_v19 = vpop.permute.xlu1 %375 }
 0x1d7   : > { %v365_v21 = vpop.permute.xlu1 %364 }
 0x1d8   : > { %v367_v25 = vadd.f32 %v824_v9, %v365_v21 }
 0x1db   : > { %v570_v35 = vpop.permute.xlu1 %569 }
 0x288   : > { %v447_v22 = vpop.f32.mrf.mxu1 }
 0x289   : > { %v448_v23 = vadd.f32 %v447_v22, %v376_v19 }
 0x28a   : > { %v831_v24 = vpop.f32.mrf.mxu1 }
 0x28b   : > { %v451_v26 = vmax.f32 %v448_v23, 0.0 }
 0x28d   : > { %v452_v27 = vadd.f32 %v451_v26, %v367_v25 }
 0x28f   : > { %v453_v28 = vmax.f32 %v452_v27, 0.0 }
 0x291   : > { %454 = vrot.lane.b32.xlu0 %v453_v28, %s968_s16  ;;  %832 = vmatprep.subr.mxu0 %v453_v28 }
 0x292   : > { %833 = vmatpush3.msra.mxu0 %v453_v28 }
 0x295   : > { %564 = vperm.xlu0 %900, %v560_v29  }
 0x303   : > { %v455_v30 = vpop.permute.xlu0 %454 }
 0x304   : > { %834 = vmatprep.subr.msk.mxu0 %vm262_vm3, %v455_v30 }
 0x305   : > { %835 = vmatpush3.msk.msra.mxu0 %vm262_vm3, %v455_v30 }
 0x306   : > { %837 = vmatmul.mubr.msk.f32.vlgmr.msra.gmra.mxu0 %vm271_vm0, %v460_v31 }
 0x307   : > { %839 = vmatprep.mubr.msk.f32.mxu0 %vm271_vm0, %v461_v32 }
 0x30a   : > { %840 = vmatmul.mubr.msk.f32.gmra.mxu0 %vm271_vm0, %v462_v33 }
 0x310   : > { %v565_v38 = vpop.permute.xlu0 %564 }
 0x3c6   : > { %v838_v36 = vpop.f32.mrf.mxu0 }
 0x3c7   : > { %v573_v37 = vadd.f32 %v838_v36, %v570_v35 }
 0x3c8   : > { %v541_v39 = vpop.f32.mrf.mxu0 }
 0x3c9   : > { %v575_v40 = vmax.f32 %v573_v37, 0.0  ;;  %v572_v41 = vadd.f32 %v565_v38, %v541_v39 }
 0x3ca   : > { %v841_v52 = vpop.f32.mrf.mxu0 }
 0x3cb   : > { %v574_v42 = vmax.f32 %v572_v41, 0.0  ;;  %592 = vrot.lane.b32.xlu1 %v575_v40, %s968_s16  ;;  %842 = vmatprep.subr.mxu1 %v575_v40 }
 0x3cc   : > { %843 = vmatpush3.msra.mxu1 %v575_v40  ;;  %v551_v55 = vpop.f32.mrf.mxu0 }
 0x3cd   : > { %590 = vrot.lane.b32.xlu0 %v574_v42, %s968_s16  ;;  %844 = vmatprep.subr.mxu1 %v574_v42 }
 0x3ce   : > { %845 = vmatpush3.msra.mxu1 %v574_v42 }
 0x3cf   : > { %602 = vperm.xlu1 %901, %v598_v43  }
 0x3d1   : > { %607 = vperm.xlu0 %900, %v599_v44  }
 0x3d3   : > { %580 = vperm.xlu1 %901, %v576_v45  }
 0x3d5   : > { %585 = vperm.xlu0 %900, %v577_v46  }
 0x43d   : > { %v593_v47 = vpop.permute.xlu1 %592 }
 0x43e   : > { %846 = vmatprep.subr.msk.mxu1 %vm262_vm3, %v593_v47 }
 0x43f   : > { %v591_v48 = vpop.permute.xlu0 %590  ;;  %847 = vmatpush3.msk.msra.mxu1 %vm262_vm3, %v593_v47 }
 0x440   : > { %848 = vmatprep.subr.msk.mxu1 %vm262_vm3, %v591_v48 }
 0x441   : > { %849 = vmatpush3.msk.msra.mxu1 %vm262_vm3, %v591_v48 }
 0x442   : > { %851 = vmatmul.mubr.msk.f32.vlgmr.msra.gmra.mxu1 %vm610_vm4, %v597_v49 }
 0x44a   : > { %v603_v51 = vpop.permute.xlu1 %602 }
 0x44c   : > { %v608_v50 = vpop.permute.xlu0 %607 }
 0x44e   : > { %v581_v57 = vpop.permute.xlu1 %580 }
 0x44f   : > { %v588_v62 = vadd.f32 %v581_v57, %v551_v55 }
 0x450   : > { %v586_v53 = vpop.permute.xlu0 %585 }
 0x451   : > { %v589_v59 = vadd.f32 %v841_v52, %v586_v53 }
 0x502   : > { %v852_v54 = vpop.f32.mrf.mxu1 }
 0x503   : > { %v689_v56 = vadd.f32 %v852_v54, %v608_v50 }
 0x504   : > { %v683_v58 = vpop.f32.mrf.mxu1 }
 0x505   : > { %v693_v60 = vmax.f32 %v689_v56, 0.0  ;;  %v684_v61 = vadd.f32 %v683_v58, %v603_v51 }
 0x507   : > { %v695_v63 = vadd.f32 %v693_v60, %v589_v59  ;;  %v692_v0 = vmax.f32 %v684_v61, 0.0 }
 0x509   : > { %v697_v1 = vmax.f32 %v695_v63, 0.0  ;;  %v694_v2 = vadd.f32 %v692_v0, %v588_v62 }
 0x50b   : > { %699 = vst [vmem:[%s242_s9 + $0x8] sm:$0xff] %v697_v1  ;;  %v696_v3 = vmax.f32 %v694_v2, 0.0 }
 0x50d   : > { %698 = vst [vmem:[%s242_s9] sm:$0xff] %v696_v3 }
 0x50e   : > { %915 = shalt.err (!%p912_p3)
}
 0x50f   : > { %s916_s20 = scalar_lea.hbm %s1156_s14, 256  ;;  %s920_s28 = scalar_lea.hbm %s1204_s6, 512 }
 0x510   : > { %p917_p4 = scmp.ne.s32.totalorder %s1156_s14, %s916_s20  ;;  %p921_p9 = scmp.lt.s32.totalorder %s1156_s14, %s1204_s6 }
 0x511   : > { %p922_p10 = scmp.lt.s32.totalorder %s920_s28, %s916_s20 }
 0x512   : > { %p918_p7 = pnand %p917_p4, %p1046_p5 }
 0x513   : > { %p923_p11 = por %p922_p10, %p921_p9 }
 0x514   : > { %p919_p8 = pneg %p918_p7 }
 0x516   : > { %p924_p12 = pnand %p923_p11, %p919_p8 }
 0x518   : > { %927 = shalt.err (!%p924_p12)
}
 0x519   : > { %s970_s11 = smov 128   ;;  %s971_s12 = smov 256  }
 0x51a   : > { %s972_s13 = smov 8  }
 0x51b   : > { %853 = dma.vmem_to_hbm [thread:$0]  (%p1046_p5), %s1151_s10, 256, %s1156_s14, %s1158_s15, %s970_s11, %s971_s12, %s972_s13  }
 0x51c PF: > { %p859_p13 = scmp.ge.s32.totalorder %s962_s24, 2  ;;  %s728_s17 = sand.u32 1, %s950_s21  }
 0x51d   : > { %s729_s25 = scalar_lea.sflag [#allocation3], %s728_s17 }
 0x51e   : > { %p856_p0 = pnand %p859_p13, %p1050_p6 }
 0x520   : > { %p857_p1 = pneg %p856_p0 }
 0x522   : > { %945 = dma.done.wait (%p857_p1), %s729_s25, 256  }
 0x523   : > { %947 = vsyncadd (%p857_p1), %s729_s25, 4294967040  ;;  %p16_p2 = scmp.ge.s32.totalorder %s1033_s27, 4   ;;  %s1207_s21 = smov %s954_s22 }
 0x524   : > { %s1208_s22 = smov %s958_s23  ;;  %s1209_s23 = smov %s1044_s30 }
 0x525   : > { %s1210_s24 = smov %s1033_s27  ;;  %18 = sbr.rel (!%p16_p2) target bundleno = 3 (0x3), region = 79 }
 0x52a   :  { %734 = vsyncpa [#allocation3], 1 }
 0x52b   :  { %736 = vsyncpa [#allocation3 + $0x1], 1 }

</bundles_post_ra>
